<compile_context>
chip_gen: v7x
topology: tpu7x:2x2x1
jax: 0.10.0
libtpu: 0.0.40
codegen_flags: <defaults>
</compile_context>

<pallas_src>
import functools

import numpy as np
import jax
import jax.numpy as jnp
from jax.experimental import pallas as pl
from jax.experimental.pallas import tpu as pltpu


def _attn_dist_kernel(q_ref, c_ref, m_ref, lab_ref, cv_ref, lsc_ref, *,
                      nc1, exp_in_bf16):
    # bf16 MXU operands (f32 accumulation via preferred_element_type); casting
    # in-kernel keeps the wrapper free of extra HBM copies.
    q = q_ref[...].astype(jnp.bfloat16)       # (Bb, N, D)
    c = c_ref[...].astype(jnp.bfloat16)       # (Bb, CS, D)
    m = m_ref[...]                            # (Bb, 1, CS)  f32
    lab = lab_ref[...]                        # (Bb, 1, CS)  int32

    # attn[b,n,j] = (q_n . c_j) * mask_j  (multiplicative mask, as in reference)
    attn = jnp.einsum("bnd,bcd->bnc", q, c,
                      preferred_element_type=jnp.float32)           # (Bb, N, CS)
    attn = attn * m

    # Max-shifted softmax over the context axis: exp exactly once; the bf16
    # exp tensor feeds both matmuls below.
    mx = jnp.max(attn, axis=-1, keepdims=True)                      # (Bb, N, 1)
    shifted = attn - mx
    if exp_in_bf16:
        # v6e / v7x: bf16 EUP is ~2x f32 and the tensor is consumed in bf16.
        p_bf = jnp.exp(shifted.astype(jnp.bfloat16))                # (Bb, N, CS)
        s = jnp.sum(p_bf.astype(jnp.float32), axis=-1, keepdims=True)
    else:
        # v5e and older: no bf16 EUP; keep exp in f32.
        p_f32 = jnp.exp(shifted)
        s = jnp.sum(p_f32, axis=-1, keepdims=True)
        p_bf = p_f32.astype(jnp.bfloat16)
    log_s = jnp.log(s)                                              # (Bb, N, 1)
    inv_s = pl.reciprocal(s, approx=True)                           # EUP slot

    # context_vector = (sum_j exp_j * c_j) / s : normalization applied after
    # the matmul on the much smaller (Bb, N, D) result.
    cv = jnp.einsum("bnc,bcd->bnd", p_bf, c,
                    preferred_element_type=jnp.float32)             # (Bb, N, D)
    cv_ref[...] = cv * inv_s

    # Transposed one-hot (classes x context) built in-kernel; the context axis
    # stays on lanes for labels, iota and the matmul's contraction dim.
    bb, _, cs = lab.shape
    cls = jax.lax.broadcasted_iota(jnp.int32, (bb, nc1, cs), 1)     # (Bb, NC1, CS)
    oh_t = (lab == cls).astype(jnp.bfloat16)                        # (Bb, NC1, CS)

    # l_softmax_classes[b,n,k] = log(sum_{j: label_j==k} exp(attn-mx)) - log(s)
    # Classes absent from the context yield log(0) = -inf (matches reference).
    class_sums = jnp.einsum("bnc,bkc->bnk", p_bf, oh_t,
                            preferred_element_type=jnp.float32)     # (Bb, N, NC1)
    lsc_ref[...] = jnp.log(class_sums) - log_s


def _device_kind():
    try:
        return jax.devices()[0].device_kind.lower()
    except Exception:
        return ""


def _pick_batch_block(B, want_two_steps):
    """Largest divisor of B (<= 8); on 2-TC parts insist on >= 2 grid steps."""
    if B <= 1:
        return 1
    cap = min(8, B // 2) if want_two_steps else min(8, B)
    for bb in range(max(cap, 1), 0, -1):
        if B % bb == 0:
            return bb
    return 1


def attention_dist_dotprod(queries, context, context_labels, mask, num_classes):
    """Pallas implementation of AttentionDist.forward ('dotprod', no prototypes)."""
    B, N, D = queries.shape
    _, CS, _ = context.shape
    NC1 = num_classes + 1

    kind = _device_kind()
    is_v7x = ("v7" in kind) or ("7x" in kind)
    exp_in_bf16 = ("v6" in kind) or is_v7x
    # 128-MiB VMEM parts (v5e/v6e) take a much higher cap than v7x (64 MiB).
    vmem_limit = (48 if (is_v7x or not kind) else 96) * 1024 * 1024

    Bb = _pick_batch_block(B, want_two_steps=is_v7x)

    # Cheap reshapes only: mask/labels carried as (B, 1, CS) so CS sits on
    # lanes and the leading sublane dim equals the full array dim.
    mask3 = mask.astype(jnp.float32)[:, None, :]
    lab3 = context_labels.astype(jnp.int32)[:, None, :]

    kernel = functools.partial(_attn_dist_kernel, nc1=NC1, exp_in_bf16=exp_in_bf16)

    cv, lsc = pl.pallas_call(
        kernel,
        grid=(B // Bb,),
        in_specs=[
            pl.BlockSpec((Bb, N, D), lambda b: (b, 0, 0)),
            pl.BlockSpec((Bb, CS, D), lambda b: (b, 0, 0)),
            pl.BlockSpec((Bb, 1, CS), lambda b: (b, 0, 0)),
            pl.BlockSpec((Bb, 1, CS), lambda b: (b, 0, 0)),
        ],
        out_specs=(
            pl.BlockSpec((Bb, N, D), lambda b: (b, 0, 0)),
            pl.BlockSpec((Bb, N, NC1), lambda b: (b, 0, 0)),
        ),
        out_shape=(
            jax.ShapeDtypeStruct((B, N, D), jnp.float32),     # context_vector
            jax.ShapeDtypeStruct((B, N, NC1), jnp.float32),   # l_softmax_classes
        ),
        compiler_params=pltpu.CompilerParams(
            dimension_semantics=("parallel",),
            vmem_limit_bytes=vmem_limit,
        ),
    )(queries, context, mask3, lab3)

    return cv, lsc


def _reference(queries, context, context_labels, mask, num_classes):
    """Pure-JAX reference mirroring the PyTorch forward."""
    NC1 = num_classes + 1
    attn = jnp.einsum("bnd,bcd->bnc", queries, context) * mask[:, None, :]
    l_softmax = jax.nn.log_softmax(attn, axis=-1)
    context_vector = jnp.einsum("bnc,bcd->bnd", jnp.exp(l_softmax), context)
    onehot = jax.nn.one_hot(context_labels, NC1)                       # (B, CS, NC1)
    onehot_logprobs = jnp.where(onehot[:, None] > 0,
                                l_softmax[..., None], -jnp.inf)        # (B, N, CS, NC1)
    l_softmax_classes = jax.scipy.special.logsumexp(onehot_logprobs, axis=2)
    return context_vector, l_softmax_classes


if __name__ == "__main__":
    # Small shapes consistent with the module's forward.
    B, N, CS, D = 2, 8, 8, 32
    NUM_CLASSES = 4                    # classes 0..4 -> C+1 = 5
    CTX_LABEL_DIMS = 16                # only used by the (unused) 'mlp' branch

    key = jax.random.PRNGKey(0)
    kq, kc, kl, km, kp, ke = jax.random.split(key, 6)

    queries = jax.random.normal(kq, (B, N, D), dtype=jnp.float32)
    context = jax.random.normal(kc, (B, CS, D), dtype=jnp.float32)
    context_labels = jax.random.randint(kl, (B, CS), 0, NUM_CLASSES + 1)
    mask = (jax.random.uniform(km, (B, CS)) > 0.2).astype(jnp.float32)

    # Deterministic parameter init (shapes per __init__); unused for the
    # 'dotprod' / use_prototype=False configuration exercised here.
    prototypes = jax.random.normal(kp, (NUM_CLASSES + 1, D)) * (
        np.sqrt(2.0 / (NUM_CLASSES + 1 + D)))          # xavier_normal_
    label_embedding = jax.random.normal(ke, (NUM_CLASSES + 1, CTX_LABEL_DIMS))

    cv, lsc = attention_dist_dotprod(queries, context, context_labels, mask,
                                     NUM_CLASSES)
    jax.block_until_ready((cv, lsc))

    # Reference computed on the same bf16-quantized matmul operands the kernel
    # uses, isolating bf16 MXU / EUP rounding (tolerances sized accordingly).
    q_q = queries.astype(jnp.bfloat16).astype(jnp.float32)
    c_q = context.astype(jnp.bfloat16).astype(jnp.float32)
    cv_ref, lsc_ref = _reference(q_q, c_q, context_labels, mask, NUM_CLASSES)
    assert np.allclose(np.asarray(cv), np.asarray(cv_ref), atol=3e-2, rtol=3e-2)
    assert np.allclose(np.asarray(lsc), np.asarray(lsc_ref), atol=3e-2, rtol=3e-2)

    print("KERNEL_OK")
</pallas_src>

<mosaic_0001>
module attributes {stable_mosaic.version = 11 : i64} {
  func.func @_attn_dist_kernel(%arg0: i32, %arg1: memref<2x8x32xf32, #tpu.memory_space<vmem>>, %arg2: memref<2x8x32xf32, #tpu.memory_space<vmem>>, %arg3: memref<2x1x8xf32, #tpu.memory_space<vmem>>, %arg4: memref<2x1x8xi32, #tpu.memory_space<vmem>>, %arg5: memref<2x8x32xf32, #tpu.memory_space<vmem>>, %arg6: memref<2x8x5xf32, #tpu.memory_space<vmem>>) attributes {dimension_semantics = [#tpu.dimension_semantics<parallel>], iteration_bounds = array<i64: 1>, scalar_prefetch = 0 : i64, scratch_operands = 0 : i64, tpu.core_type = #tpu.core_type<tc>, window_params = [{transform_indices = @transform_0, window_bounds = array<i64: 2, 8, 32>}, {transform_indices = @transform_1, window_bounds = array<i64: 2, 8, 32>}, {transform_indices = @transform_2, window_bounds = array<i64: 2, 1, 8>}, {transform_indices = @transform_3, window_bounds = array<i64: 2, 1, 8>}, {transform_indices = @transform_4, window_bounds = array<i64: 2, 8, 32>}, {transform_indices = @transform_5, window_bounds = array<i64: 2, 8, 5>}]} {
    %c0 = arith.constant 0 : index
    %c0_0 = arith.constant 0 : index
    %c0_1 = arith.constant 0 : index
    %0 = vector.load %arg1[%c0, %c0_0, %c0_1] : memref<2x8x32xf32, #tpu.memory_space<vmem>>, vector<2x8x32xf32>
    %1 = arith.truncf %0 : vector<2x8x32xf32> to vector<2x8x32xbf16>
    %c0_2 = arith.constant 0 : index
    %c0_3 = arith.constant 0 : index
    %c0_4 = arith.constant 0 : index
    %2 = vector.load %arg2[%c0_2, %c0_3, %c0_4] : memref<2x8x32xf32, #tpu.memory_space<vmem>>, vector<2x8x32xf32>
    %3 = arith.truncf %2 : vector<2x8x32xf32> to vector<2x8x32xbf16>
    %c0_5 = arith.constant 0 : index
    %c0_6 = arith.constant 0 : index
    %c0_7 = arith.constant 0 : index
    %4 = vector.load %arg3[%c0_5, %c0_6, %c0_7] : memref<2x1x8xf32, #tpu.memory_space<vmem>>, vector<2x1x8xf32>
    %c0_8 = arith.constant 0 : index
    %c0_9 = arith.constant 0 : index
    %c0_10 = arith.constant 0 : index
    %5 = vector.load %arg4[%c0_8, %c0_9, %c0_10] : memref<2x1x8xi32, #tpu.memory_space<vmem>>, vector<2x1x8xi32>
    "tpu.trace_start"() <{level = 10 : i32, message = "bnd,bcd->bnc"}> : () -> ()
    %cst = arith.constant dense<0.000000e+00> : vector<2x8x8xf32>
    %6 = tpu.matmul %1, %3, %cst {dimension_numbers = #tpu.dot_dimension_numbers<[2], [2], [1], [1], [0, 0, 0, 1, 1, 1], [0], [0]>} : vector<2x8x32xbf16>, vector<2x8x32xbf16>, vector<2x8x8xf32> -> vector<2x8x8xf32>
    "tpu.trace_stop"() : () -> ()
    %7 = vector.broadcast %4 : vector<2x1x8xf32> to vector<2x8x8xf32>
    %8 = arith.mulf %6, %7 : vector<2x8x8xf32>
    %cst_11 = arith.constant dense<0xFF800000> : vector<2x8xf32>
    %9 = vector.multi_reduction <maximumf>, %8, %cst_11 [2] : vector<2x8x8xf32> to vector<2x8xf32>
    %10 = vector.shape_cast %9 : vector<2x8xf32> to vector<2x8x1xf32>
    %11 = vector.broadcast %10 : vector<2x8x1xf32> to vector<2x8x8xf32>
    %12 = arith.subf %8, %11 : vector<2x8x8xf32>
    %13 = math.exp %12 : vector<2x8x8xf32>
    %cst_12 = arith.constant dense<0.000000e+00> : vector<2x8xf32>
    %14 = vector.multi_reduction <add>, %13, %cst_12 [2] : vector<2x8x8xf32> to vector<2x8xf32>
    %15 = vector.shape_cast %14 : vector<2x8xf32> to vector<2x8x1xf32>
    %16 = arith.truncf %13 : vector<2x8x8xf32> to vector<2x8x8xbf16>
    %17 = math.log %15 : vector<2x8x1xf32>
    %18 = tpu.reciprocal %15 {approx = true} : vector<2x8x1xf32> -> vector<2x8x1xf32>
    "tpu.trace_start"() <{level = 10 : i32, message = "bnc,bcd->bnd"}> : () -> ()
    %cst_13 = arith.constant dense<0.000000e+00> : vector<2x8x32xf32>
    %19 = tpu.matmul %16, %3, %cst_13 {dimension_numbers = #tpu.dot_dimension_numbers<[2], [1], [1], [2], [0, 0, 0, 1, 1, 2], [0], [0]>} : vector<2x8x8xbf16>, vector<2x8x32xbf16>, vector<2x8x32xf32> -> vector<2x8x32xf32>
    "tpu.trace_stop"() : () -> ()
    %20 = vector.broadcast %18 : vector<2x8x1xf32> to vector<2x8x32xf32>
    %21 = arith.mulf %19, %20 : vector<2x8x32xf32>
    %c0_14 = arith.constant 0 : index
    %c0_15 = arith.constant 0 : index
    %c0_16 = arith.constant 0 : index
    %22 = vector.load %arg5[%c0_14, %c0_15, %c0_16] : memref<2x8x32xf32, #tpu.memory_space<vmem>>, vector<2x8x32xf32>
    tpu.vector_store %arg5[%c0_14, %c0_15, %c0_16], %21 {strides = array<i32>} : memref<2x8x32xf32, #tpu.memory_space<vmem>>, vector<2x8x32xf32>,
    %23 = tpu.iota {dimensions = array<i32: 1>} : vector<2x5x8xi32>
    %24 = vector.broadcast %5 : vector<2x1x8xi32> to vector<2x5x8xi32>
    %25 = arith.cmpi eq, %24, %23 : vector<2x5x8xi32>
    %26 = arith.extui %25 : vector<2x5x8xi1> to vector<2x5x8xi32>
    %27 = arith.sitofp %26 : vector<2x5x8xi32> to vector<2x5x8xf32>
    %28 = arith.truncf %27 : vector<2x5x8xf32> to vector<2x5x8xbf16>
    "tpu.trace_start"() <{level = 10 : i32, message = "bnc,bkc->bnk"}> : () -> ()
    %cst_17 = arith.constant dense<0.000000e+00> : vector<2x8x5xf32>
    %29 = tpu.matmul %16, %28, %cst_17 {dimension_numbers = #tpu.dot_dimension_numbers<[2], [2], [1], [1], [0, 0, 0, 1, 1, 1], [0], [0]>} : vector<2x8x8xbf16>, vector<2x5x8xbf16>, vector<2x8x5xf32> -> vector<2x8x5xf32>
    "tpu.trace_stop"() : () -> ()
    %30 = math.log %29 : vector<2x8x5xf32>
    %31 = vector.broadcast %17 : vector<2x8x1xf32> to vector<2x8x5xf32>
    %32 = arith.subf %30, %31 : vector<2x8x5xf32>
    %c0_18 = arith.constant 0 : index
    %c0_19 = arith.constant 0 : index
    %c0_20 = arith.constant 0 : index
    %33 = vector.load %arg6[%c0_18, %c0_19, %c0_20] : memref<2x8x5xf32, #tpu.memory_space<vmem>>, vector<2x8x5xf32>
    tpu.vector_store %arg6[%c0_18, %c0_19, %c0_20], %32 {strides = array<i32>} : memref<2x8x5xf32, #tpu.memory_space<vmem>>, vector<2x8x5xf32>,
    return
  }
  func.func @transform_0(%arg0: i32) -> (i32, i32, i32) {
    %c0_i32 = arith.constant 0 : i32
    %c0_i32_0 = arith.constant 0 : i32
    %c0_i32_1 = arith.constant 0 : i32
    return %arg0, %c0_i32, %c0_i32_0 : i32, i32, i32
  }
  func.func @transform_1(%arg0: i32) -> (i32, i32, i32) {
    %c0_i32 = arith.constant 0 : i32
    %c0_i32_0 = arith.constant 0 : i32
    %c0_i32_1 = arith.constant 0 : i32
    return %arg0, %c0_i32, %c0_i32_0 : i32, i32, i32
  }
  func.func @transform_2(%arg0: i32) -> (i32, i32, i32) {
    %c0_i32 = arith.constant 0 : i32
    %c0_i32_0 = arith.constant 0 : i32
    %c0_i32_1 = arith.constant 0 : i32
    return %arg0, %c0_i32, %c0_i32_0 : i32, i32, i32
  }
  func.func @transform_3(%arg0: i32) -> (i32, i32, i32) {
    %c0_i32 = arith.constant 0 : i32
    %c0_i32_0 = arith.constant 0 : i32
    %c0_i32_1 = arith.constant 0 : i32
    return %arg0, %c0_i32, %c0_i32_0 : i32, i32, i32
  }
  func.func @transform_4(%arg0: i32) -> (i32, i32, i32) {
    %c0_i32 = arith.constant 0 : i32
    %c0_i32_0 = arith.constant 0 : i32
    %c0_i32_1 = arith.constant 0 : i32
    return %arg0, %c0_i32, %c0_i32_0 : i32, i32, i32
  }
  func.func @transform_5(%arg0: i32) -> (i32, i32, i32) {
    %c0_i32 = arith.constant 0 : i32
    %c0_i32_0 = arith.constant 0 : i32
    %c0_i32_1 = arith.constant 0 : i32
    return %arg0, %c0_i32, %c0_i32_0 : i32, i32, i32
  }
}

</mosaic_0001>

<bundles_post_ra>
// kernel: tpu_custom_call.1
= control target key start
LH: loop header
LB: loop body
LE: loop exit
PB: predicated region body
PF: predicated region fallthrough
CT: control target
= control target key end

     0   :  { %11 = vsyncpa [#allocation3], 0  ;;  %s865_s0 = inlined_call_operand.hbm [shape: f32[2,8,32], index: 0, kind: input, shape index: {}]   ;;  %s866_s1 = inlined_call_operand.hbm [shape: f32[2,8,32], index: 1, kind: input, shape index: {}]   ;;  %s867_s2 = inlined_call_operand.hbm [shape: f32[2,1,8], index: 2, kind: input, shape index: {}]   ;;  %s868_s3 = inlined_call_operand.hbm [shape: s32[2,1,8], index: 3, kind: input, shape index: {}]   ;;  %s869_s4 = inlined_call_operand.hbm [shape: f32[2,8,32], index: 4, kind: output, shape index: {0}]   ;;  %s870_s5 = inlined_call_operand.hbm [shape: f32[2,8,5], index: 5, kind: output, shape index: {1}]  }
   0x1   :  { %12 = vsyncpa [#allocation6], 0 }
   0x2   :  { %13 = vsyncpa [#allocation9], 0 }
   0x3   :  { %14 = vsyncpa [#allocation4], 0 }
   0x4   :  { %15 = vsyncpa [#allocation12], 0  ;;  %s696_s18 = smov [#allocation5]   ;;  %s697_s20 = smov [#allocation2]  }
   0x5   :  { %s33_s19 = sshll.u32 %s696_s18, 4  ;;  %s21_s21 = sshll.u32 %s697_s20, 4  ;;  %s34_s19 = int_to_ptr.vmem [resolvable:$true] %s33_s19  ;;  %s738_s21 = int_to_ptr.vmem [resolvable:$true] %s21_s21 }
   0x6   :  { %s554_s24 = scalar_lea.hbm %s866_s1, 256 }
   0x7   :  { %p555_p0 = scmp.ne.s32.totalorder %s866_s1, %s554_s24  ;;  %p558_p1 = scmp.lt.u32.totalorder %s554_s24, %s866_s1 }
   0x9   :  { %p560_p2 = pnand %p558_p1, %p555_p0 }
   0xb   :  { %563 = shalt.err (!%p560_p2)
}
   0xc   :  { %s564_s29 = scalar_lea.vmem %s34_s19, 256  ;;  %p569_p4 = scmp.lt.s32.totalorder %s34_s19, %s34_s19 }
   0xd   :  { %p565_p3 = scmp.ne.s32.totalorder %s34_s19, %s564_s29  ;;  %p570_p5 = scmp.lt.s32.totalorder %s564_s29, %s564_s29 }
   0xf   :  { %p571_p6 = por %p570_p5, %p569_p4 }
  0x11   :  { %p572_p7 = pnand %p571_p6, %p565_p3 }
  0x13   :  { %575 = shalt.err (!%p572_p7)
}
  0x14   :  { %s698_s30 = smov 128   ;;  %s699_s6 = smov 8  }
  0x15   :  { %39 = dma.hbm_to_vmem [thread:$0]  %s866_s1, 256, %s34_s19, [#allocation6], %s698_s30, %s698_s30, %s699_s6  }
  0x16   :  { %s576_s11 = scalar_lea.hbm %s865_s0, 256 }
  0x17   :  { %p577_p8 = scmp.ne.s32.totalorder %s865_s0, %s576_s11  ;;  %p580_p9 = scmp.lt.u32.totalorder %s576_s11, %s865_s0 }
  0x19   :  { %p582_p10 = pnand %p580_p9, %p577_p8 }
  0x1b   :  { %585 = shalt.err (!%p582_p10)
}
  0x1c   :  { %s586_s16 = scalar_lea.vmem %s738_s21, 256  ;;  %p591_p12 = scmp.lt.s32.totalorder %s738_s21, %s738_s21 }
  0x1d   :  { %p587_p11 = scmp.ne.s32.totalorder %s738_s21, %s586_s16  ;;  %p592_p13 = scmp.lt.s32.totalorder %s586_s16, %s586_s16 }
  0x1f   :  { %p593_p0 = por %p592_p13, %p591_p12 }
  0x21   :  { %p594_p1 = pnand %p593_p0, %p587_p11 }
  0x23   :  { %597 = shalt.err (!%p594_p1)
}
  0x24   :  { %27 = dma.hbm_to_vmem [thread:$0]  %s865_s0, 256, %s738_s21, [#allocation3], %s698_s30, %s698_s30, %s699_s6  }
  0x25   :  { %s700_s18 = smov [#allocation7]   ;;  %s598_s23 = scalar_lea.hbm %s867_s2, 32 }
  0x26   :  { %s45_s19 = sshll.u32 %s700_s18, 4  ;;  %p599_p2 = scmp.ne.s32.totalorder %s867_s2, %s598_s23  ;;  %s46_s19 = int_to_ptr.vmem [resolvable:$true] %s45_s19 }
  0x27   :  { %p602_p3 = scmp.lt.u32.totalorder %s598_s23, %s867_s2 }
  0x29   :  { %p604_p4 = pnand %p602_p3, %p599_p2 }
  0x2b   :  { %607 = shalt.err (!%p604_p4)
}
  0x2c   :  { %s608_s28 = scalar_lea.vmem %s46_s19, 32  ;;  %p613_p6 = scmp.lt.s32.totalorder %s46_s19, %s46_s19 }
  0x2d   :  { %p609_p5 = scmp.ne.s32.totalorder %s46_s19, %s608_s28  ;;  %p614_p7 = scmp.lt.s32.totalorder %s608_s28, %s608_s28 }
  0x2f   :  { %p615_p8 = por %p614_p7, %p613_p6 }
  0x31   :  { %p616_p9 = pnand %p615_p8, %p609_p5 }
  0x33   :  { %619 = shalt.err (!%p616_p9)
}
  0x34   :  { %s701_s0 = smov 16   ;;  %s702_s21 = smov 1  }
  0x35   :  { %51 = dma.hbm_to_vmem [thread:$0]  %s867_s2, 32, %s46_s19, [#allocation6], %s701_s0, %s701_s0, %s702_s21  }
  0x36   :  { %s703_s8 = smov [#allocation8]   ;;  %s620_s12 = scalar_lea.hbm %s868_s3, 32 }
  0x37   :  { %s57_s9 = sshll.u32 %s703_s8, 4  ;;  %p621_p10 = scmp.ne.s32.totalorder %s868_s3, %s620_s12  ;;  %s58_s9 = int_to_ptr.vmem [resolvable:$true] %s57_s9 }
  0x38   :  { %p624_p11 = scmp.lt.u32.totalorder %s620_s12, %s868_s3 }
  0x3a   :  { %p626_p12 = pnand %p624_p11, %p621_p10 }
  0x3c   :  { %629 = shalt.err (!%p626_p12)
}
  0x3d   :  { %s630_s1 = scalar_lea.vmem %s58_s9, 32  ;;  %p635_p0 = scmp.lt.s32.totalorder %s58_s9, %s58_s9 }
  0x3e   :  { %p631_p13 = scmp.ne.s32.totalorder %s58_s9, %s630_s1  ;;  %p636_p1 = scmp.lt.s32.totalorder %s630_s1, %s630_s1 }
  0x40   :  { %p637_p2 = por %p636_p1, %p635_p0 }
  0x42   :  { %p638_p3 = pnand %p637_p2, %p631_p13 }
  0x44   :  { %641 = shalt.err (!%p638_p3)
}
  0x45   :  { %63 = dma.hbm_to_vmem [thread:$0]  %s868_s3, 32, %s58_s9, [#allocation9], %s701_s0, %s701_s0, %s702_s21  }
  0x46   :  { %686 = dma.done.wait [#allocation3], 256  }
  0x47   :  { %687 = vsyncadd [#allocation3], 4294967040 }
  0x48   :  { %688 = dma.done.wait [#allocation6], 288  }
  0x49   :  { %689 = vsyncadd [#allocation6], 4294967008 }
  0x4a   :  { %690 = dma.done.wait [#allocation9], 32  }
  0x4b   :  { %691 = vsyncadd [#allocation9], 4294967264  ;;  %v704_v0 = vmov 0.0   ;;  %vm705_vm0 = vmmov 0   ;;  %v81_v1 = vld [vmem:[#allocation5] sm:$0xff]  ;;  %vm89_vm1 = vcmask 261120   ;;  %v318_v27 = vlaneseq }
  0x4c   :  { %490 = vmatprep.subr.bf16.mxu0 %v704_v0  ;;  %496 = vmatprep.subr.bf16.mxu1 %v704_v0  ;;  %v82_v2 = vld [vmem:[#allocation5 + $0x8] sm:$0xff]  ;;  %v83_v3 = vpack.c.bf16 %v81_v1, %v81_v1  ;;  %v77_v7 = vld [vmem:[#allocation2] sm:$0xff]  ;;  %v78_v8 = vld [vmem:[#allocation2 + $0x8] sm:$0xff]  ;;  %vm196_vm2 = vcmask 64512   ;;  %vm226_vm3 = vcmask 1043456   ;;  %s706_s3 = smov [#allocation10]  }
  0x4d   :  { %492 = vmatprep.mubr.msk.bf16.mxu0 %vm705_vm0, %v704_v0  ;;  %498 = vmatprep.mubr.msk.bf16.mxu1 %vm705_vm0, %v704_v0  ;;  %v84_v4 = vpack.c.bf16 %v82_v2, %v82_v2  ;;  %v79_v9 = vpack.c.bf16 %v77_v7, %v77_v7  ;;  %v80_v10 = vpack.c.bf16 %v78_v8, %v78_v8  ;;  %v468_v11 = vld [vmem:[#allocation7] ss:$0 sm:$0xff]  ;;  %v469_v12 = vld [vmem:[#allocation7 + $0x1] ss:$0 sm:$0xff]  ;;  %v319_v30 = vshrl.u32 %v318_v27, 7  ;;  %s436_s18 = sshll.u32 %s706_s3, 4  ;;  %s437_s18 = int_to_ptr.vmem [resolvable:$true] %s436_s18 }
  0x4e   :  { %v94_v5 = vsel %vm89_vm1, %v83_v3, 0  ;;  %v227_v25 = vsel %vm226_vm3, %v83_v3, 0  ;;  %v472_v32 = vld [vmem:[#allocation8] ss:$0 sm:$0xff]  ;;  %v473_v36 = vld [vmem:[#allocation8 + $0x1] ss:$0 sm:$0xff]  ;;  %p647_p5 = scmp.lt.s32.totalorder %s437_s18, %s437_s18 }
  0x4f   :  { %v140_v6 = vsel %vm89_vm1, %v84_v4, 0  ;;  %491 = vmatpush3.bf16.xpose.msra.mxu0 %v94_v5  ;;  %v272_v26 = vsel %vm226_vm3, %v84_v4, 0  ;;  %vm328_vm4 = vcmp.eq.s32.totalorder %v472_v32, %v319_v30  ;;  %vm329_vm5 = vcmp.eq.s32.totalorder %v473_v36, %v319_v30  ;;  %s642_s19 = scalar_lea.vmem %s437_s18, 256 }
  0x50   :  { %497 = vmatpush3.bf16.xpose.msra.mxu1 %v140_v6  ;;  %502 = vmatprep.subr.bf16.mxu0 %v704_v0  ;;  %v474_v37 = vsel %vm328_vm4, 1.0, %v704_v0  ;;  %v475_v39 = vsel %vm329_vm5, 1.0, %v704_v0  ;;  %p643_p4 = scmp.ne.s32.totalorder %s437_s18, %s642_s19  ;;  %p648_p6 = scmp.lt.s32.totalorder %s642_s19, %s642_s19 }
  0x51   :  { %508 = vmatprep.subr.bf16.mxu1 %v704_v0  ;;  %v334_v38 = vpack.c.bf16 %v474_v37, %v474_v37  ;;  %v335_v44 = vpack.c.bf16 %v475_v39, %v475_v39 }
  0x52   :  { %p649_p7 = por %p648_p6, %p647_p5 }
  0x53   :  { %v337_v43 = vsel %vm196_vm2, %v334_v38, 0  ;;  %v380_v48 = vsel %vm196_vm2, %v335_v44, 0 }
  0x54   :  { %p650_p8 = pnand %p649_p7, %p643_p4 }
  0x56   :  { %493 = vmatmul.mubr.msk.bf16.vlgmr.msra.gmra.mrb[0].mxu0 %vm89_vm1, %v79_v9 }
  0x57   :  { %499 = vmatmul.mubr.msk.bf16.vlgmr.msra.gmra.mrb[0].mxu1 %vm89_vm1, %v80_v10  ;;  %504 = vmatprep.mubr.msk.bf16.mxu0 %vm705_vm0, %v704_v0 }
  0x58   :  { %510 = vmatprep.mubr.msk.bf16.mxu1 %vm705_vm0, %v704_v0  ;;  %503 = vmatpush3.bf16.msra.mxu0 %v227_v25 }
  0x59   :  { %509 = vmatpush3.bf16.msra.mxu1 %v272_v26  ;;  %514 = vmatprep.subr.bf16.mxu0 %v704_v0 }
  0x5a   :  { %520 = vmatprep.subr.bf16.mxu1 %v704_v0 }
 0x129   :  { %v130_v13 = vpop.f32.mrb[0].mxu0 }
 0x12a   :  { %v176_v14 = vpop.f32.mrb[0].mxu1  ;;  %v194_v15 = vmul.f32 %v468_v11, %v130_v13  ;;  %v494_v16 = vpop.f32.mrb[1].mxu0 }
 0x12b   :  { %v195_v17 = vmul.f32 %v469_v12, %v176_v14  ;;  %v500_v18 = vpop.f32.mrb[1].mxu1  ;;  %v133_v19 = vpop.f32.mrb[2].mxu0 }
 0x12c   :  { %v179_v20 = vpop.f32.mrb[2].mxu1  ;;  %v495_v21 = vpop.f32.mrb[3].mxu0  ;;  %v197_v23 = vsel %vm196_vm2, %v194_v15, -inf }
 0x12d   :  { %v501_v22 = vpop.f32.mrb[3].mxu1  ;;  %198 = vmax.xlane.f32.xlu0 %v197_v23  ;;  %v200_v24 = vsel %vm196_vm2, %v195_v17, -inf }
 0x131   :  { %201 = vmax.xlane.f32.xlu0 %v200_v24 }
 0x1ba   :  { %v199_v28 = vpop.xlane.xlu0 %198 }
 0x1bb   :  { %v203_v29 = vsub.f32 %v194_v15, %v199_v28 }
 0x1bd   :  { %v205_v31 = vmul.f32 1.442695, %v203_v29 }
 0x1be   :  { %v202_v33 = vpop.xlane.xlu0 %201 }
 0x1bf   :  { %538 = vpow2.f32 %v205_v31  ;;  %v204_v34 = vsub.f32 %v195_v17, %v202_v33 }
 0x1c1   :  { %v207_v35 = vmul.f32 1.442695, %v204_v34 }
 0x1c3   :  { %540 = vpow2.f32 %v207_v35 }
 0x1c9   :  { %v539_v40 = vpop.eup %538 }
 0x1ca   :  { %v209_v41 = vsel %vm196_vm2, %v539_v40, 0.0  ;;  %v215_v42 = vpack.c.bf16 %v539_v40, %v539_v40 }
 0x1cb   :  { %210 = vadd.xlane.f32.xlu1 %v209_v41 }
 0x1cc   :  { %505 = vmatmul.mubr.msk.bf16.vlgmr.msra.gmra.mrb[4].mxu0 %vm196_vm2, %v215_v42 }
 0x1cd   :  { %v541_v45 = vpop.eup %540  ;;  %515 = vmatpush3.bf16.xpose.msra.mxu0 %v337_v43  ;;  %516 = vmatprep.mubr.msk.bf16.mxu0 %vm705_vm0, %v704_v0 }
 0x1ce   :  { %v212_v46 = vsel %vm196_vm2, %v541_v45, 0.0  ;;  %v216_v47 = vpack.c.bf16 %v541_v45, %v541_v45 }
 0x1cf   :  { %213 = vadd.xlane.f32.xlu1 %v212_v46 }
 0x1d0   :  { %511 = vmatmul.mubr.msk.bf16.vlgmr.msra.gmra.mrb[4].mxu1 %vm196_vm2, %v216_v47 }
 0x1d1   :  { %521 = vmatpush3.bf16.xpose.msra.mxu1 %v380_v48  ;;  %522 = vmatprep.mubr.msk.bf16.mxu1 %vm705_vm0, %v704_v0 }
 0x1d4   :  { %517 = vmatmul.mubr.msk.bf16.vlgmr.msra.gmra.mrb[8].mxu0 %vm196_vm2, %v215_v42 }
 0x1d8   :  { %523 = vmatmul.mubr.msk.bf16.vlgmr.msra.gmra.mrb[8].mxu1 %vm196_vm2, %v216_v47 }
 0x258   :  { %v211_v49 = vpop.xlane.xlu1 %210 }
 0x259   :  { %542 = vrcp.f32 %v211_v49 }
 0x25c   :  { %v214_v50 = vpop.xlane.xlu1 %213 }
 0x25d   :  { %544 = vrcp.f32 %v214_v50 }
 0x25e   :  { %546 = vlog2.f32 %v211_v49 }
 0x263   :  { %v543_v51 = vpop.eup %542 }
 0x267   :  { %v545_v57 = vpop.eup %544 }
 0x29f   :  { %v263_v52 = vpop.f32.mrb[4].mxu0 }
 0x2a0   :  { %v314_v53 = vmul.f32 %v543_v51, %v263_v52  ;;  %v506_v54 = vpop.f32.mrb[5].mxu0 }
 0x2a1   :  { %v266_v55 = vpop.f32.mrb[6].mxu0 }
 0x2a2   :  { %316 = vst.msk [vmem:[#allocation10] sm:$0xff] %vm89_vm1, %v314_v53  ;;  %v507_v56 = vpop.f32.mrb[7].mxu0 }
 0x2a3   :  { %v308_v58 = vpop.f32.mrb[4].mxu1 }
 0x2a4   :  { %v315_v59 = vmul.f32 %v545_v57, %v308_v58  ;;  %v512_v60 = vpop.f32.mrb[5].mxu1 }
 0x2a5   :  { %v311_v61 = vpop.f32.mrb[6].mxu1 }
 0x2a6   :  { %317 = vst.msk [vmem:[#allocation10 + $0x8] sm:$0xff] %vm89_vm1, %v315_v59  ;;  %v513_v62 = vpop.f32.mrb[7].mxu1 }
 0x2a7   :  { %v373_v63 = vpop.f32.mrb[8].mxu0 }
 0x2a8   :  { %653 = shalt.err (!%p650_p8)
}
 0x2a9   :  { %s654_s23 = scalar_lea.hbm %s869_s4, 256 }
 0x2aa   :  { %p655_p9 = scmp.ne.s32.totalorder %s869_s4, %s654_s23  ;;  %p658_p10 = scmp.lt.u32.totalorder %s654_s23, %s869_s4 }
 0x2ac   :  { %p660_p11 = pnand %p658_p10, %p655_p9 }
 0x2ae   :  { %663 = shalt.err (!%p660_p11)
}
 0x2af   :  { %442 = dma.vmem_to_hbm [thread:$0]  %s437_s18, 256, %s869_s4, [#allocation4], %s698_s30, %s698_s30, %s699_s6   ;;  %548 = vlog2.f32 %v373_v63  ;;  %v518_v0 = vpop.f32.mrb[9].mxu0  ;;  %v416_v3 = vpop.f32.mrb[8].mxu1  ;;  %vm428_vm6 = vcmask 39936  }
 0x2b0   :  { %v376_v1 = vpop.f32.mrb[10].mxu0  ;;  %550 = vlog2.f32 %v214_v50  ;;  %v524_v4 = vpop.f32.mrb[9].mxu1  ;;  %s707_s21 = smov [#allocation11]  }
 0x2b1   :  { %v519_v2 = vpop.f32.mrb[11].mxu0  ;;  %552 = vlog2.f32 %v416_v3  ;;  %v419_v5 = vpop.f32.mrb[10].mxu1  ;;  %s448_s4 = sshll.u32 %s707_s21, 4  ;;  %s449_s4 = int_to_ptr.vmem [resolvable:$true] %s448_s4 }
 0x2b2   :  { %v525_v6 = vpop.f32.mrb[11].mxu1  ;;  %v547_v7 = vpop.eup %546  ;;  %s664_s29 = scalar_lea.vmem %s449_s4, 256  ;;  %p669_p13 = scmp.lt.s32.totalorder %s449_s4, %s449_s4 }
 0x2b3   :  { %v218_v9 = vmul.f32 0.6931472, %v547_v7  ;;  %p665_p12 = scmp.ne.s32.totalorder %s449_s4, %s664_s29  ;;  %p670_p0 = scmp.lt.s32.totalorder %s664_s29, %s664_s29 }
 0x2b5   :  { %p671_p1 = por %p670_p0, %p669_p13 }
 0x2b7   :  { %p672_p2 = pnand %p671_p1, %p665_p12 }
 0x2b9   :  { %v549_v8 = vpop.eup %548 }
 0x2ba   :  { %v423_v10 = vmul.f32 0.6931472, %v549_v8  ;;  %v551_v11 = vpop.eup %550 }
 0x2bb   :  { %v553_v13 = vpop.eup %552  ;;  %v220_v14 = vmul.f32 0.6931472, %v551_v11 }
 0x2bc   :  { %v426_v12 = vsub.f32 %v423_v10, %v218_v9  ;;  %v425_v15 = vmul.f32 0.6931472, %v553_v13 }
 0x2be   :  { %429 = vst.msk [vmem:[#allocation11] sm:$0xff] %vm428_vm6, %v426_v12  ;;  %v427_v16 = vsub.f32 %v425_v15, %v220_v14 }
 0x2c0   :  { %430 = vst.msk [vmem:[#allocation11 + $0x8] sm:$0xff] %vm428_vm6, %v427_v16 }
 0x2c1   :  { %675 = shalt.err (!%p672_p2)
}
 0x2c2   :  { %s676_s9 = scalar_lea.hbm %s870_s5, 256 }
 0x2c3   :  { %p677_p3 = scmp.ne.s32.totalorder %s870_s5, %s676_s9  ;;  %p680_p4 = scmp.lt.u32.totalorder %s676_s9, %s870_s5 }
 0x2c5   :  { %p682_p5 = pnand %p680_p4, %p677_p3 }
 0x2c7   :  { %685 = shalt.err (!%p682_p5)
}
 0x2c8   :  { %454 = dma.vmem_to_hbm [thread:$0]  %s449_s4, 256, %s870_s5, [#allocation12], %s698_s30, %s698_s30, %s699_s6  }
 0x2c9   :  { %692 = dma.done.wait [#allocation4], 256  }
 0x2ca   :  { %693 = vsyncadd [#allocation4], 4294967040 }
 0x2cb   :  { %694 = dma.done.wait [#allocation12], 256  }
 0x2cc   :  { %695 = vsyncadd [#allocation12], 4294967040 }
 0x2cd   :  { %461 = vsyncpa [#allocation3], 1 }
 0x2ce   :  { %462 = vsyncpa [#allocation6], 1 }
 0x2cf   :  { %463 = vsyncpa [#allocation9], 1 }
 0x2d0   :  { %464 = vsyncpa [#allocation4], 1 }
 0x2d1   :  { %465 = vsyncpa [#allocation12], 1 }

</bundles_post_ra>
